<compile_context>
chip_gen: v5e
topology: v5e:2x2
jax: 0.10.0
libtpu: 0.0.40
codegen_flags: <defaults>
</compile_context>

<pallas_src>
import numpy as np
import jax
import jax.numpy as jnp
from jax.experimental import pallas as pl
from jax.experimental.pallas import tpu as pltpu


# ----------------------------------------------------------------------------
# Pallas kernels: fused Q/K/V projection (one [TM,H] x [H,3H] matmul).
# ----------------------------------------------------------------------------
def _qkv_fused_kernel(x_ref, w_ref, o_ref):
    acc = jnp.dot(x_ref[...], w_ref[...], preferred_element_type=jnp.float32)
    o_ref[...] = acc.astype(o_ref.dtype)


def _qkv_fused_pe_kernel(x_ref, w_ref, pe_ref, o_ref):
    acc = jnp.dot(x_ref[...], w_ref[...], preferred_element_type=jnp.float32)
    pe = pe_ref[...].astype(jnp.float32)
    # Replicate the [TM, H] positional block across the fused 3H output once.
    acc = acc + jnp.concatenate([pe, pe, pe], axis=-1)
    o_ref[...] = acc.astype(o_ref.dtype)


def _round_up(x, m):
    return (x + m - 1) // m * m


def _choose_tm(M):
    """Row-tile size: big enough to hide DMA, small enough to bound VMEM,
    and always giving a grid of length >= 2 so megacore / pipelining engage."""
    for cand in (512, 256, 128):
        if M >= 2 * cand:
            return cand
    # Small problem: split into ~2 tiles, keep a multiple of 8 (sublane).
    return max(8, _round_up(pl.cdiv(M, 2), 8))


def _qkv_pallas(x2d, w_fused, pe2d=None):
    """x2d: [M, H]; w_fused: [H, 3H]; pe2d: optional [M, H]. Returns [M, 3H]."""
    M, H = x2d.shape
    H3 = w_fused.shape[1]

    TM = _choose_tm(M)
    Mp = _round_up(M, TM)
    if Mp != M:
        pad = Mp - M
        x2d = jnp.pad(x2d, ((0, pad), (0, 0)))
        if pe2d is not None:
            pe2d = jnp.pad(pe2d, ((0, pad), (0, 0)))

    grid = (Mp // TM,)

    x_spec = pl.BlockSpec((TM, H), lambda i: (i, 0))
    # Weight block is revisited every grid step (constant index_map).
    # TODO(synk): single-buffer the weight block once pl.Buffered(1) is safe,
    # to halve its VMEM footprint under v7x's 64 MiB budget.
    w_spec = pl.BlockSpec((H, H3), lambda i: (0, 0))
    o_spec = pl.BlockSpec((TM, H3), lambda i: (i, 0))

    if pe2d is None:
        kernel = _qkv_fused_kernel
        in_specs = [x_spec, w_spec]
        args = (x2d, w_fused)
    else:
        kernel = _qkv_fused_pe_kernel
        in_specs = [x_spec, w_spec, x_spec]
        args = (x2d, w_fused, pe2d)

    out = pl.pallas_call(
        kernel,
        out_shape=jax.ShapeDtypeStruct((Mp, H3), x2d.dtype),
        grid_spec=pltpu.PrefetchScalarGridSpec(
            num_scalar_prefetch=0,
            grid=grid,
            in_specs=in_specs,
            out_specs=o_spec,
        ),
        compiler_params=pltpu.CompilerParams(
            dimension_semantics=("parallel",),
            vmem_limit_bytes=64 * 1024 * 1024,
        ),
    )(*args)

    return out[:M]


# ----------------------------------------------------------------------------
# PositionalEncoding equivalent (pure-JAX glue: table build + index gather).
# ----------------------------------------------------------------------------
def _sinusoid_table(n_position, d_hid):
    pos = np.arange(n_position, dtype=np.float64)[:, None]
    hid = np.arange(d_hid, dtype=np.int64)[None, :]
    angle = pos / np.power(10000.0, 2.0 * (hid // 2) / d_hid)
    table = np.array(angle)
    table[:, 0::2] = np.sin(table[:, 0::2])
    table[:, 1::2] = np.cos(table[:, 1::2])
    return jnp.asarray(table, dtype=jnp.float32)  # [n_position, d_hid]


def _positional_encoding(mask, d_hid):
    # mask: [B, L] (0/1).  Mirrors PositionalEncoding.forward with pos=None.
    B, L = mask.shape
    table = _sinusoid_table(L, d_hid)                              # [L, H]
    last_item_idx = jnp.sum(mask, axis=1).reshape(-1, 1) - 1       # [B, 1]
    flag = jnp.arange(L, dtype=jnp.int32)[None, :]                 # [1, L]
    flag = jnp.abs(jnp.tile(flag, (B, 1)) - last_item_idx.astype(jnp.int32))
    return table[flag]                                             # [B, L, H]


# ----------------------------------------------------------------------------
# Self_Attention.forward
# ----------------------------------------------------------------------------
def self_attention_forward(inputs, mask, wq, wk, wv, pos_emb=False):
    """inputs: [B, L, H]; mask: [B, L]; wq/wk/wv: [H, H] (nn.Linear.weight)."""
    B, L, H = inputs.shape
    x2d = inputs.reshape(B * L, H)

    # Fused weight: [H, 3H] = [Wq^T | Wk^T | Wv^T]  (y = x @ W^T per projection)
    w_fused = jnp.concatenate([wq.T, wk.T, wv.T], axis=1)

    if pos_emb:
        pe2d = _positional_encoding(mask, H).reshape(B * L, H).astype(inputs.dtype)
    else:
        pe2d = None  # static: the no-pe kernel variant skips the read entirely

    qkv = _qkv_pallas(x2d, w_fused, pe2d)          # [B*L, 3H]
    q2d = qkv[:, 0 * H:1 * H]
    k2d = qkv[:, 1 * H:2 * H]
    v2d = qkv[:, 2 * H:3 * H]
    return (q2d.reshape(B, L, H), k2d.reshape(B, L, H), v2d.reshape(B, L, H))


# Pure-JAX reference for validation.
def _reference(inputs, mask, wq, wk, wv, pos_emb=False):
    q = inputs @ wq.T
    k = inputs @ wk.T
    v = inputs @ wv.T
    if pos_emb:
        pe = _positional_encoding(mask, inputs.shape[-1])
        q, k, v = q + pe, k + pe, v + pe
    return q, k, v


if __name__ == "__main__":
    B, L, H = 2, 8, 32  # batch, seq, hiddenSize (transformer_head unused in forward)

    key = jax.random.PRNGKey(0)
    k_x, k_q, k_k, k_v = jax.random.split(key, 4)

    inputs = jax.random.normal(k_x, (B, L, H), dtype=jnp.float32)
    # nn.Linear default init: U(-1/sqrt(H), 1/sqrt(H))
    bound = 1.0 / np.sqrt(H)
    wq = jax.random.uniform(k_q, (H, H), jnp.float32, -bound, bound)
    wk = jax.random.uniform(k_k, (H, H), jnp.float32, -bound, bound)
    wv = jax.random.uniform(k_v, (H, H), jnp.float32, -bound, bound)

    # mask: first `lens[b]` positions valid.
    lens = np.array([8, 5])
    mask_np = np.zeros((B, L), dtype=np.float32)
    for b in range(B):
        mask_np[b, : lens[b]] = 1.0
    mask = jnp.asarray(mask_np)

    ok = True
    for pe_flag in (False, True):
        q, k, v = self_attention_forward(inputs, mask, wq, wk, wv, pos_emb=pe_flag)
        jax.block_until_ready((q, k, v))
        rq, rk, rv = _reference(inputs, mask, wq, wk, wv, pos_emb=pe_flag)
        ok &= bool(jnp.allclose(q, rq, atol=1e-5))
        ok &= bool(jnp.allclose(k, rk, atol=1e-5))
        ok &= bool(jnp.allclose(v, rv, atol=1e-5))

    if ok:
        print("KERNEL_OK")
    else:
        print("KERNEL_MISMATCH")
</pallas_src>

<mosaic_0001>
module attributes {stable_mosaic.version = 11 : i64} {
  func.func @_qkv_fused_kernel(%arg0: i32, %arg1: memref<8x32xf32, #tpu.memory_space<vmem>>, %arg2: memref<32x96xf32, #tpu.memory_space<vmem>>, %arg3: memref<8x96xf32, #tpu.memory_space<vmem>>) attributes {dimension_semantics = [#tpu.dimension_semantics<parallel>], iteration_bounds = array<i64: 2>, scalar_prefetch = 0 : i64, scratch_operands = 0 : i64, tpu.core_type = #tpu.core_type<tc>, window_params = [{transform_indices = @transform_0, window_bounds = array<i64: 8, 32>}, {pipeline_mode = #tpu.pipeline_mode<synchronous>, transform_indices = @transform_1, window_bounds = array<i64: 32, 96>}, {transform_indices = @transform_2, window_bounds = array<i64: 8, 96>}]} {
    %c0 = arith.constant 0 : index
    %c0_0 = arith.constant 0 : index
    %0 = vector.load %arg1[%c0, %c0_0] : memref<8x32xf32, #tpu.memory_space<vmem>>, vector<8x32xf32>
    %c0_1 = arith.constant 0 : index
    %c0_2 = arith.constant 0 : index
    %1 = vector.load %arg2[%c0_1, %c0_2] : memref<32x96xf32, #tpu.memory_space<vmem>>, vector<32x96xf32>
    %cst = arith.constant dense<0.000000e+00> : vector<8x96xf32>
    %2 = tpu.matmul %0, %1, %cst {dimension_numbers = #tpu.dot_dimension_numbers<[1], [0], [0], [1], [0, 0, 1, 1], [], []>} : vector<8x32xf32>, vector<32x96xf32>, vector<8x96xf32> -> vector<8x96xf32>
    %c0_3 = arith.constant 0 : index
    %c0_4 = arith.constant 0 : index
    %3 = vector.load %arg3[%c0_3, %c0_4] : memref<8x96xf32, #tpu.memory_space<vmem>>, vector<8x96xf32>
    tpu.vector_store %arg3[%c0_3, %c0_4], %2 {strides = array<i32>} : memref<8x96xf32, #tpu.memory_space<vmem>>, vector<8x96xf32>,
    return
  }
  func.func @transform_0(%arg0: i32) -> (i32, i32) {
    %c0_i32 = arith.constant 0 : i32
    %c0_i32_0 = arith.constant 0 : i32
    return %arg0, %c0_i32 : i32, i32
  }
  func.func @transform_1(%arg0: i32) -> (i32, i32) {
    %c0_i32 = arith.constant 0 : i32
    %c0_i32_0 = arith.constant 0 : i32
    %c0_i32_1 = arith.constant 0 : i32
    return %c0_i32, %c0_i32_0 : i32, i32
  }
  func.func @transform_2(%arg0: i32) -> (i32, i32) {
    %c0_i32 = arith.constant 0 : i32
    %c0_i32_0 = arith.constant 0 : i32
    return %arg0, %c0_i32 : i32, i32
  }
}

</mosaic_0001>

<bundles_post_ra>
// kernel: tpu_custom_call.1
= control target key start
LH: loop header
LB: loop body
LE: loop exit
PB: predicated region body
PF: predicated region fallthrough
CT: control target
= control target key end

     0   :  { %7 = vsyncpa [#allocation3], 0  ;;  %s665_s0 = inlined_call_operand.hbm [shape: f32[16,32], index: 0, kind: input, shape index: {}]   ;;  %s666_s1 = inlined_call_operand.hbm [shape: f32[32,96], index: 1, kind: input, shape index: {}]   ;;  %s667_s2 = inlined_call_operand.hbm [shape: f32[16,96], index: 2, kind: output, shape index: {}]  }
   0x1   :  { %9 = vsyncpa [#allocation3 + $0x1], 0 }
   0x2   :  { %10 = vsyncpa [#allocation6], 0 }
   0x3   :  { %11 = vsyncpa [#allocation4], 0 }
   0x4   :  { %13 = vsyncpa [#allocation4 + $0x1], 0  ;;  %s529_s9 = smov 0   ;;  %s531_s10 = smov 0  }
   0x5   :  { %s533_s11 = smov 0   ;;  %s535_s12 = smov 0  }
   0x6 LB: > { %s108_s15 = sshll.u32 %s666_s1, 4  ;;  %s553_s16 = sadd.s32 4294967295, %s509_s12   ;;  %s509_s12 = sphi %s535_s12, %s677_s12   ;;  %s505_s11 = sphi %s533_s11, %s676_s11   ;;  %s501_s10 = sphi %s531_s10, %s675_s10   ;;  %s497_s9 = sphi %s529_s9, %s674_s9   ;;  %s109_s15 = int_to_ptr.hbm [resolvable:$true] %s108_s15 }
   0x7   : > { %p306_p0 = scmp.ge.s32.totalorder %s509_s12, 1  ;;  %p40_p1 = scmp.eq.s32.totalorder %s553_s16, 0 }
   0x8   : > { %p97_p2 = scmp.lt.s32.totalorder %s509_s12, 3  ;;  %s511_s18 = smov [#allocation5]  }
   0x9   : > { %s110_s19 = sshll.u32 %s511_s18, 4  ;;  %s512_s20 = smov 128   ;;  %s111_s19 = int_to_ptr.vmem [resolvable:$true] %s110_s19 }
   0xa   : > { %p558_p3 = pnand %p306_p0, %p97_p2  ;;  %s513_s21 = smov 8  }
   0xb   : > { %s305_s22 = sadd.s32 4294967294, %s509_s12   ;;  %s569_s23 = sadd.s32 1, %s509_s12  }
   0xc   : > { %p328_p4 = pneg %p558_p3  ;;  %s26_s24 = sadd.s32 1, %s505_s11 }
   0xd   : > { %s23_s25 = ssub.s32 %s509_s12, %s569_s23  ;;  %p33_p7 = scmp.ne.s32.totalorder %s505_s11, %s501_s10 }
   0xe   : > { %p329_p6 = pnand %p328_p4, %p40_p1  ;;  %p24_p8 = scmp.eq.s32.totalorder %s23_s25, 0 }
   0xf   : > { %p34_p9 = scmp.eq.s32.totalorder %s509_s12, 0  ;;  %p39_p10 = scmp.ne.s32.totalorder %s501_s10, %s497_s9 }
  0x10   : > { %331 = dma.hbm_to_vmem [thread:$0]  (!%p329_p6), %s109_s15, 512, %s111_s19, [#allocation6], %s512_s20, %s512_s20, %s513_s21  }
  0x11   : > { %p84_p11 = scmp.eq.s32.totalorder %s553_s16, 1  ;;  %p585_p12 = por %p40_p1, %p39_p10 }
  0x12   : > { %s581_s26 = scalar_select %p24_p8, %s505_s11, %s26_s24  }
  0x13   : > { %p589_p13 = por %p84_p11, %p33_p7  ;;  %p90_p0 = scmp.eq.s32.totalorder %s305_s22, 1 }
  0x14   : > { %p35_p2 = por %p34_p9, %p33_p7  ;;  %s124_s29 = sand.u32 1, %s505_s11  }
  0x15   : > { %p594_p4 = por %p90_p0, %p39_p10  ;;  %p341_p6 = scmp.lt.s32.totalorder %s509_s12, 2 }
  0x16   : > { %s309_s3 = sshll.u32 %s124_s29, 3  ;;  %s310_s4 = sshll.u32 %s509_s12, 3 }
  0x17   : > { %s132_s7 = scalar_lea.hbm %s665_s0, %s310_s4  ;;  %s128_s13 = scalar_lea.vmem [#allocation2], %s309_s3 }
  0x18   : > { %s134_s8 = sshll.u32 %s132_s7, 4  ;;  %s136_s14 = sshll.u32 %s128_s13, 4  ;;  %s135_s8 = int_to_ptr.hbm [resolvable:$true] %s134_s8  ;;  %s137_s14 = int_to_ptr.vmem [resolvable:$true] %s136_s14 }
  0x19   : > { %p603_p8 = pnand %p341_p6, %p35_p2  ;;  %s125_s18 = scalar_lea.sflag [#allocation3], %s124_s29 }
  0x1a   : > { %s409_s19 = sshra.s32 %s135_s8, 4  ;;  %s416_s24 = scalar_lea.hbm %s665_s0, 16  ;;  %s410_s19 = int_to_ptr.hbm [resolvable:$true] %s409_s19 }
  0x1b   : > { %s411_s20 = scalar_lea.hbm %s410_s19, 8  ;;  %p413_p9 = pneg %p603_p8 }
  0x1c   : > { %p412_p7 = scmp.ne.s32.totalorder %s410_s19, %s411_s20  ;;  %p417_p0 = scmp.lt.s32.totalorder %s410_s19, %s665_s0 }
  0x1d   : > { %p418_p2 = scmp.lt.s32.totalorder %s416_s24, %s411_s20 }
  0x1e   : > { %p414_p10 = pnand %p413_p9, %p412_p7 }
  0x1f   : > { %p419_p6 = por %p418_p2, %p417_p0 }
  0x20   : > { %p415_p11 = pneg %p414_p10 }
  0x22   : > { %p420_p5 = pnand %p419_p6, %p415_p11 }
  0x24   : > { %423 = shalt.err (!%p420_p5)
}
  0x25   : > { %335 = dma.hbm_to_vmem [thread:$0]  (!%p603_p8), %s135_s8, 128, %s137_s14, %s125_s18  }
  0x26   : > { %145 = sbr.rel (%p558_p3) target bundleno = 183 (0xb7), region = 28  ;;  %s620_s29 = sand.u32 (!%p558_p3), 1, %s501_s10  }
  0x27   : > { %s312_s4 = sshll.u32 (!%p558_p3), %s620_s29, 3  ;;  %s148_s5 = scalar_lea.sflag (!%p558_p3), [#allocation3], %s620_s29 }
  0x28   : > { %s151_s6 = scalar_lea.vmem (!%p558_p3), [#allocation2], %s312_s4 }
  0x2b   : > { %484 = dma.done.wait (%p585_p12), %s148_s5, 128  }
  0x2c   : > { %486 = vsyncadd (%p585_p12), %s148_s5, 4294967168 }
  0x2d   : > { %488 = dma.done.wait (%p40_p1), [#allocation6], 512  }
  0x2e   : > { %490 = vsyncadd (%p40_p1), [#allocation6], 4294966784  ;;  %v182_v0 = vld [vmem:[#allocation5 + $0x18] sm:$0xff]  ;;  %v181_v1 = vld [vmem:[#allocation5 + $0x10] sm:$0xff]  ;;  %vm183_vm0 = vcmask 261120   ;;  %s317_s17 = sshll.u32 %s553_s16, 3 }
  0x2f   : > { %199 = vmatpush.msra.mxu0 %v182_v0  ;;  %v180_v2 = vld [vmem:[#allocation5 + $0x8] sm:$0xff]  ;;  %v179_v3 = vld [vmem:[#allocation5] sm:$0xff]  ;;  %v178_v4 = vld [vmem:[%s151_s6] sm:$0xff]  ;;  %s220_s8 = scalar_lea.hbm %s667_s2, %s317_s17  ;;  %s177_s13 = scalar_lea.vmem [#allocation7], %s312_s4  ;;  %vm207_vm1 = vcmask 785408  }
  0x30   : > { %s222_s14 = sshll.u32 %s177_s13, 4  ;;  %s224_s15 = sshll.u32 %s220_s8, 4  ;;  %s223_s14 = int_to_ptr.vmem [resolvable:$true] %s222_s14  ;;  %s225_s15 = int_to_ptr.hbm [resolvable:$true] %s224_s15 }
  0x31   : > { %200 = vmatpush.msra.mxu0 %v181_v1  ;;  %s210_s18 = scalar_lea.sflag [#allocation4], %s620_s29  ;;  %s453_s19 = sshra.s32 %s225_s15, 4  ;;  %s454_s19 = int_to_ptr.hbm [resolvable:$true] %s453_s19 }
  0x32   : > { %s455_s20 = scalar_lea.hbm %s454_s19, 8  ;;  %s459_s22 = scalar_lea.hbm %s667_s2, 16 }
  0x33   : > { %201 = vmatpush.msra.mxu0 %v180_v2  ;;  %p456_p1 = scmp.ne.s32.totalorder %s454_s19, %s455_s20  ;;  %p460_p12 = scmp.lt.s32.totalorder %s454_s19, %s667_s2 }
  0x34   : > { %p461_p8 = scmp.lt.s32.totalorder %s459_s22, %s455_s20 }
  0x35   : > { %202 = vmatpush.msra.mxu0 %v179_v3  ;;  %p457_p3 = pnand %p456_p1, %p589_p13 }
  0x36   : > { %315 = vmatmul.msk.f32.vlgmr.msra.gmra.mxu0 %vm183_vm0, %v178_v4  ;;  %p462_p7 = por %p461_p8, %p460_p12 }
  0x37   : > { %p458_p5 = pneg %p457_p3 }
  0x39   : > { %p463_p9 = pnand %p462_p7, %p458_p5 }
  0xb3   : > { %v204_v5 = vpop.f32.mrf.mxu0 }
  0xb4   : > { %208 = vst.msk [vmem:[%s177_s13] sm:$0xff] %vm207_vm1, %v204_v5 }
  0xb5   : > { %466 = shalt.err (!%p463_p9)
}
  0xb6   : > { %326 = dma.vmem_to_hbm [thread:$0]  (%p589_p13), %s223_s14, 128, %s225_s15, %s210_s18  }
  0xb7 PF: > { %s236_s3 = sand.u32 1, %s497_s9   ;;  %p673_p10 = scmp.ge.s32.totalorder %s509_s12, 2 }
  0xb8   : > { %s237_s29 = scalar_lea.sflag [#allocation4], %s236_s3 }
  0xb9   : > { %p337_p11 = pnand %p673_p10, %p594_p4 }
  0xbb   : > { %p338_p0 = pneg %p337_p11 }
  0xbd   : > { %492 = dma.done.wait (%p338_p0), %s237_s29, 128  }
  0xbe   : > { %494 = vsyncadd (%p338_p0), %s237_s29, 4294967168  ;;  %p16_p2 = scmp.ge.s32.totalorder %s569_s23, 4   ;;  %s674_s9 = smov %s501_s10 }
  0xbf   : > { %s675_s10 = smov %s505_s11  ;;  %s676_s11 = smov %s581_s26 }
  0xc0   : > { %s677_s12 = smov %s569_s23  ;;  %18 = sbr.rel (!%p16_p2) target bundleno = 6 (0x6), region = 77 }
  0xc5   :  { %243 = vsyncpa [#allocation3], 1 }
  0xc6   :  { %245 = vsyncpa [#allocation3 + $0x1], 1 }
  0xc7   :  { %246 = vsyncpa [#allocation6], 1 }
  0xc8   :  { %247 = vsyncpa [#allocation4], 1 }
  0xc9   :  { %249 = vsyncpa [#allocation4 + $0x1], 1 }

</bundles_post_ra>
